<compile_context>
chip_gen: v6e
topology: v6e:2x2x1
jax: 0.10.0
libtpu: 0.0.40
codegen_flags: <defaults>
</compile_context>

<pallas_src>
import jax
import jax.numpy as jnp
from jax import lax
from jax.experimental import pallas as pl
from jax.experimental.pallas import tpu as pltpu


def _round_up(x, m):
    return (x + m - 1) // m * m


def _cdiv(a, b):
    return -(-a // b)


# Cap on statically-unrolled 128-lane-aligned chunks per grid step (code-size
# bound; per-step DMA ~2-3 MiB for f32 which keeps the ~0.35us/step overhead
# small on large inputs while compiling quickly for small ones).
_MAX_CHUNKS = 96


def _tpu_vmem_and_cores():
    """Best-effort trace-time hardware query with safe fallbacks."""
    vmem_cap = 64 * 1024 * 1024          # conservative: v7x per-TensorCore VMEM
    cores = 1
    try:
        info = pltpu.get_tpu_info()
        v = getattr(info, "vmem_capacity_bytes", None)
        if isinstance(v, int) and v > 0:
            vmem_cap = v
        for name in ("num_tensorcores", "tensorcores_per_chip", "num_cores", "core_count"):
            c = getattr(info, name, None)
            if isinstance(c, int) and c > 0:
                cores = max(cores, c)
                break
    except Exception:
        pass
    try:
        c = getattr(jax.devices()[0], "num_cores", None)
        if isinstance(c, int) and c > 0:
            cores = max(cores, c)
    except Exception:
        pass
    return vmem_cap, cores


def _choose_fold(nc, hw):
    """Fold spatial samples into sublanes when it improves sublane utilisation.

    Only folds when hw % fold == 0, so the (nc, hw) -> (nc*fold, hw//fold)
    reshape is a free row-major view (no padding, no extra HBM pass).
    """
    best_f = 1
    best_score = nc / _round_up(nc, 8)
    for f in range(2, 9):
        r = nc * f
        if hw % f or r > 32:
            continue
        score = r / _round_up(r, 8)
        if score > best_score + 1e-9:
            best_f, best_score = f, score
    return best_f


def _make_dice_kernel(*, n_chunks, out_w, row_block, steps_per_split, tile, hw_f,
                      need_mask):
    def kernel(p_ref, t_ref, inter_ref, union_ref):
        j = pl.program_id(2)                    # spatial step within split (reduction axis)

        if need_mask:
            s = pl.program_id(1)                # spatial split (parallel axis, v7x)
            gstep = s * steps_per_split + j
            valid0 = hw_f - gstep * tile        # lanes [0, valid0) of this tile are real data
            lane = lax.broadcasted_iota(jnp.int32, (row_block, out_w), 1)

        # Per-step partial sums, carried in vregs (small: row_block x out_w).
        pt = jnp.zeros((row_block, out_w), jnp.float32)
        un = jnp.zeros((row_block, out_w), jnp.float32)
        for k in range(n_chunks):               # static, bounded unroll; static slices only
            lo = k * out_w
            pk = p_ref[:, lo:lo + out_w].astype(jnp.float32)
            tk = t_ref[:, lo:lo + out_w].astype(jnp.float32)
            c_pt = pk * tk
            c_un = pk * pk + tk * tk
            if need_mask:
                m = lane < (valid0 - lo)        # zero out-of-range lanes (incl. fully OOB steps)
                c_pt = jnp.where(m, c_pt, 0.0)
                c_un = jnp.where(m, c_un, 0.0)
            pt = pt + c_pt
            un = un + c_un

        # Accumulate directly into the resident output blocks (lane-dense).
        @pl.when(j == 0)
        def _():
            inter_ref[0] = pt
            union_ref[0] = un

        @pl.when(j != 0)
        def _():
            inter_ref[0] = inter_ref[0] + pt
            union_ref[0] = union_ref[0] + un

    return kernel


def dice_loss(preds, targets, smooth=1e-5, *, force_splits=None):
    """Dice loss matching the PyTorch DiceLoss.forward semantics.

    preds, targets: (N, C, H, W) float arrays.  Returns a scalar float32.
    """
    assert preds.shape == targets.shape and preds.ndim == 4
    n, c, h, w = preds.shape
    nc, hw = n * c, h * w

    vmem_cap, cores = _tpu_vmem_and_cores()

    # ---- layout: (N, C, H, W) -> (rows, hw_f) via free reshapes only ----------
    fold = _choose_fold(nc, hw)
    rows = nc * fold
    hw_f = hw // fold
    p2d = preds.reshape(rows, hw_f)
    t2d = targets.reshape(rows, hw_f)

    # ---- row (sublane) blocking ------------------------------------------------
    row_block = rows if rows <= 32 else 32      # full-extent exception or multiple of 8
    n_row_blocks = _cdiv(rows, row_block)       # last block may be partial (garbage rows
    rows_out = n_row_blocks * row_block         # are sliced off in the wrapper)
    rows_pad = _round_up(row_block, 8)

    # ---- lane tiling: 128-aligned static chunks, small vreg footprint ----------
    chunk_w = max(128, (4096 // rows_pad) // 128 * 128)

    if hw_f <= chunk_w:
        # Whole spatial extent in one full-extent block: no masking, no padding.
        n_splits, steps_per_split, n_chunks = 1, 1, 1
        out_w = hw_f
        tile = hw_f
        need_mask = False
    else:
        n_cover = _cdiv(hw_f, chunk_w)          # chunks needed to cover hw_f
        n_fit = hw_f // chunk_w                 # max whole chunks with tile <= hw_f
        if force_splits is not None:
            n_splits = int(force_splits)
        else:
            # 2-way spatial split only when a multi-TC chip would otherwise run
            # a single serial block (no effect / not used on 1-TC v5e/v6e).
            n_splits = 2 if (cores >= 2 and n_row_blocks == 1 and n_cover >= 2) else 1
        n_splits = max(1, min(n_splits, n_cover))
        per_split = _cdiv(n_cover, n_splits)
        steps_per_split = _cdiv(per_split, _MAX_CHUNKS)
        n_chunks = min(_cdiv(per_split, steps_per_split), n_fit)
        steps_per_split = _cdiv(per_split, n_chunks)
        out_w = chunk_w
        tile = n_chunks * chunk_w
        need_mask = (n_splits * steps_per_split * tile) != hw_f

    grid = (n_row_blocks, n_splits, steps_per_split)
    max_lane_block = _cdiv(hw_f, tile) - 1

    def in_map(i, s, j):
        # Clamp so padded (fully-masked) trailing steps re-read an in-bounds block.
        return (i, jnp.minimum(s * steps_per_split + j, max_lane_block))

    def out_map(i, s, j):
        return (s, i, 0)                        # resident across the reduction axis j

    in_spec = pl.BlockSpec((row_block, tile), in_map)
    out_spec = pl.BlockSpec((1, row_block, out_w), out_map)
    out_sds = jax.ShapeDtypeStruct((n_splits, rows_out, out_w), jnp.float32)

    kernel = _make_dice_kernel(
        n_chunks=n_chunks, out_w=out_w, row_block=row_block,
        steps_per_split=steps_per_split, tile=tile, hw_f=hw_f, need_mask=need_mask)

    # Generation-aware scoped-VMEM limit (usage here is only a few MiB anyway).
    vmem_limit = 96 * 1024 * 1024 if vmem_cap >= 128 * 1024 * 1024 else 48 * 1024 * 1024

    inter, union = pl.pallas_call(
        kernel,
        out_shape=(out_sds, out_sds),
        grid_spec=pltpu.PrefetchScalarGridSpec(
            num_scalar_prefetch=0,
            grid=grid,
            in_specs=[in_spec, in_spec],
            out_specs=[out_spec, out_spec],
        ),
        compiler_params=pltpu.CompilerParams(
            dimension_semantics=("parallel", "parallel", "arbitrary"),
            vmem_limit_bytes=vmem_limit,
        ),
    )(p2d, t2d)

    # ---- tiny finishing math in the wrapper (per-(N,C) dice, torch semantics) --
    inter = jnp.sum(inter, axis=(0, 2))[:rows]
    union = jnp.sum(union, axis=(0, 2))[:rows]
    if fold > 1:
        inter = inter.reshape(nc, fold).sum(axis=1)
        union = union.reshape(nc, fold).sum(axis=1)

    dice = (2.0 * inter + smooth) / (union + smooth)
    # torch: dice = sum(dice) / dice.shape[0]  -> divide by N (dice has shape (N, C))
    return 1.0 - jnp.sum(dice) / jnp.float32(n)


def dice_loss_ref(preds, targets, smooth=1e-5):
    """Pure-JAX reference matching the torch module exactly."""
    intersection = jnp.sum(preds * targets, axis=(2, 3))
    union = jnp.sum(preds * preds, axis=(2, 3)) + jnp.sum(targets * targets, axis=(2, 3))
    dice = (2.0 * intersection + smooth) / (union + smooth)
    dice = jnp.sum(dice) / dice.shape[0]
    return 1.0 - dice


if __name__ == "__main__":
    key = jax.random.PRNGKey(0)

    cases = [
        ((2, 4, 16, 16), None),  # nc == 8, hw == 256: single full-extent block, no mask
        ((1, 3, 17, 33), None),  # odd nc / odd hw: sublane fold + full-extent lane block
        ((1, 8, 40, 40), 2),     # multi-step, forced 2-way parallel spatial split + tail mask
        ((5, 8, 12, 12), None),  # rows > 32: multiple row blocks, partial last row block
    ]
    for shp, force_splits in cases:
        key, k1, k2 = jax.random.split(key, 3)
        preds = jax.nn.sigmoid(jax.random.normal(k1, shp, dtype=jnp.float32))
        targets = (jax.random.uniform(k2, shp) > 0.5).astype(jnp.float32)

        out = jax.block_until_ready(dice_loss(preds, targets, force_splits=force_splits))
        ref = jax.block_until_ready(dice_loss_ref(preds, targets))
        assert jnp.allclose(out, ref, rtol=1e-5, atol=1e-5), (shp, out, ref)

    print("KERNEL_OK")
</pallas_src>

<mosaic_0001>
module attributes {stable_mosaic.version = 11 : i64} {
  func.func @kernel(%arg0: i32, %arg1: i32, %arg2: i32, %arg3: memref<8x256xf32, #tpu.memory_space<vmem>>, %arg4: memref<8x256xf32, #tpu.memory_space<vmem>>, %arg5: memref<1x8x256xf32, #tpu.memory_space<vmem>>, %arg6: memref<1x8x256xf32, #tpu.memory_space<vmem>>) attributes {dimension_semantics = [#tpu.dimension_semantics<parallel>, #tpu.dimension_semantics<parallel>, #tpu.dimension_semantics<arbitrary>], iteration_bounds = array<i64: 1, 1, 1>, scalar_prefetch = 0 : i64, scratch_operands = 0 : i64, tpu.core_type = #tpu.core_type<tc>, window_params = [{transform_indices = @transform_0, window_bounds = array<i64: 8, 256>}, {transform_indices = @transform_1, window_bounds = array<i64: 8, 256>}, {transform_indices = @transform_2, window_bounds = array<i64: 1, 8, 256>}, {transform_indices = @transform_3, window_bounds = array<i64: 1, 8, 256>}]} {
    %cst = arith.constant 0.000000e+00 : f32
    %0 = vector.broadcast %cst : f32 to vector<8x256xf32>
    %cst_0 = arith.constant 0.000000e+00 : f32
    %1 = vector.broadcast %cst_0 : f32 to vector<8x256xf32>
    %c0 = arith.constant 0 : index
    %c0_1 = arith.constant 0 : index
    %2 = vector.load %arg3[%c0, %c0_1] : memref<8x256xf32, #tpu.memory_space<vmem>>, vector<8x256xf32>
    %c0_2 = arith.constant 0 : index
    %c0_3 = arith.constant 0 : index
    %3 = vector.load %arg4[%c0_2, %c0_3] : memref<8x256xf32, #tpu.memory_space<vmem>>, vector<8x256xf32>
    %4 = arith.mulf %2, %3 : vector<8x256xf32>
    %5 = arith.mulf %2, %2 : vector<8x256xf32>
    %6 = arith.mulf %3, %3 : vector<8x256xf32>
    %7 = arith.addf %5, %6 : vector<8x256xf32>
    %8 = arith.addf %0, %4 : vector<8x256xf32>
    %9 = arith.addf %1, %7 : vector<8x256xf32>
    %c0_i32 = arith.constant 0 : i32
    %10 = arith.cmpi eq, %arg2, %c0_i32 : i32
    %11 = arith.extui %10 : i1 to i32
    %c0_i32_4 = arith.constant 0 : i32
    %12 = arith.cmpi ne, %11, %c0_i32_4 : i32
    scf.if %12 {
      %c0_7 = arith.constant 0 : index
      %c0_8 = arith.constant 0 : index
      %c0_9 = arith.constant 0 : index
      %16 = vector.load %arg5[%c0_7, %c0_8, %c0_9] : memref<1x8x256xf32, #tpu.memory_space<vmem>>, vector<1x8x256xf32>
      %17 = vector.shape_cast %16 : vector<1x8x256xf32> to vector<8x256xf32>
      %18 = vector.shape_cast %8 : vector<8x256xf32> to vector<1x8x256xf32>
      tpu.vector_store %arg5[%c0_7, %c0_8, %c0_9], %18 {strides = array<i32>} : memref<1x8x256xf32, #tpu.memory_space<vmem>>, vector<1x8x256xf32>,
      %c0_10 = arith.constant 0 : index
      %c0_11 = arith.constant 0 : index
      %c0_12 = arith.constant 0 : index
      %19 = vector.load %arg6[%c0_10, %c0_11, %c0_12] : memref<1x8x256xf32, #tpu.memory_space<vmem>>, vector<1x8x256xf32>
      %20 = vector.shape_cast %19 : vector<1x8x256xf32> to vector<8x256xf32>
      %21 = vector.shape_cast %9 : vector<8x256xf32> to vector<1x8x256xf32>
      tpu.vector_store %arg6[%c0_10, %c0_11, %c0_12], %21 {strides = array<i32>} : memref<1x8x256xf32, #tpu.memory_space<vmem>>, vector<1x8x256xf32>,
    } else {
    }
    %c0_i32_5 = arith.constant 0 : i32
    %13 = arith.cmpi ne, %arg2, %c0_i32_5 : i32
    %14 = arith.extui %13 : i1 to i32
    %c0_i32_6 = arith.constant 0 : i32
    %15 = arith.cmpi ne, %14, %c0_i32_6 : i32
    scf.if %15 {
      %c0_7 = arith.constant 0 : index
      %c0_8 = arith.constant 0 : index
      %c0_9 = arith.constant 0 : index
      %16 = vector.load %arg5[%c0_7, %c0_8, %c0_9] : memref<1x8x256xf32, #tpu.memory_space<vmem>>, vector<1x8x256xf32>
      %17 = vector.shape_cast %16 : vector<1x8x256xf32> to vector<8x256xf32>
      %18 = arith.addf %17, %8 : vector<8x256xf32>
      %c0_10 = arith.constant 0 : index
      %c0_11 = arith.constant 0 : index
      %c0_12 = arith.constant 0 : index
      %19 = vector.load %arg5[%c0_10, %c0_11, %c0_12] : memref<1x8x256xf32, #tpu.memory_space<vmem>>, vector<1x8x256xf32>
      %20 = vector.shape_cast %19 : vector<1x8x256xf32> to vector<8x256xf32>
      %21 = vector.shape_cast %18 : vector<8x256xf32> to vector<1x8x256xf32>
      tpu.vector_store %arg5[%c0_10, %c0_11, %c0_12], %21 {strides = array<i32>} : memref<1x8x256xf32, #tpu.memory_space<vmem>>, vector<1x8x256xf32>,
      %c0_13 = arith.constant 0 : index
      %c0_14 = arith.constant 0 : index
      %c0_15 = arith.constant 0 : index
      %22 = vector.load %arg6[%c0_13, %c0_14, %c0_15] : memref<1x8x256xf32, #tpu.memory_space<vmem>>, vector<1x8x256xf32>
      %23 = vector.shape_cast %22 : vector<1x8x256xf32> to vector<8x256xf32>
      %24 = arith.addf %23, %9 : vector<8x256xf32>
      %c0_16 = arith.constant 0 : index
      %c0_17 = arith.constant 0 : index
      %c0_18 = arith.constant 0 : index
      %25 = vector.load %arg6[%c0_16, %c0_17, %c0_18] : memref<1x8x256xf32, #tpu.memory_space<vmem>>, vector<1x8x256xf32>
      %26 = vector.shape_cast %25 : vector<1x8x256xf32> to vector<8x256xf32>
      %27 = vector.shape_cast %24 : vector<8x256xf32> to vector<1x8x256xf32>
      tpu.vector_store %arg6[%c0_16, %c0_17, %c0_18], %27 {strides = array<i32>} : memref<1x8x256xf32, #tpu.memory_space<vmem>>, vector<1x8x256xf32>,
    } else {
    }
    return
  }
  func.func @transform_0(%arg0: i32, %arg1: i32, %arg2: i32) -> (i32, i32) {
    %c1_i32 = arith.constant 1 : i32
    %0 = arith.muli %arg1, %c1_i32 : i32
    %1 = arith.addi %0, %arg2 : i32
    %c0_i32 = arith.constant 0 : i32
    %2 = arith.minsi %1, %c0_i32 : i32
    %c0_i32_0 = arith.constant 0 : i32
    return %arg0, %2 : i32, i32
  }
  func.func @transform_1(%arg0: i32, %arg1: i32, %arg2: i32) -> (i32, i32) {
    %c1_i32 = arith.constant 1 : i32
    %0 = arith.muli %arg1, %c1_i32 : i32
    %1 = arith.addi %0, %arg2 : i32
    %c0_i32 = arith.constant 0 : i32
    %2 = arith.minsi %1, %c0_i32 : i32
    %c0_i32_0 = arith.constant 0 : i32
    return %arg0, %2 : i32, i32
  }
  func.func @transform_2(%arg0: i32, %arg1: i32, %arg2: i32) -> (i32, i32, i32) {
    %c0_i32 = arith.constant 0 : i32
    %c0_i32_0 = arith.constant 0 : i32
    return %arg1, %arg0, %c0_i32 : i32, i32, i32
  }
  func.func @transform_3(%arg0: i32, %arg1: i32, %arg2: i32) -> (i32, i32, i32) {
    %c0_i32 = arith.constant 0 : i32
    %c0_i32_0 = arith.constant 0 : i32
    return %arg1, %arg0, %c0_i32 : i32, i32, i32
  }
}

</mosaic_0001>

<bundles_post_ra>
// kernel: tpu_custom_call.1
= control target key start
LH: loop header
LB: loop body
LE: loop exit
PB: predicated region body
PF: predicated region fallthrough
CT: control target
= control target key end

     0   :  { %9 = vsyncpa [#allocation3], 0  ;;  %s261_s0 = inlined_call_operand.hbm [shape: f32[8,256], index: 0, kind: input, shape index: {}]   ;;  %s262_s1 = inlined_call_operand.hbm [shape: f32[8,256], index: 1, kind: input, shape index: {}]   ;;  %s263_s2 = inlined_call_operand.hbm [shape: f32[1,8,256], index: 2, kind: output, shape index: {0}]   ;;  %s264_s3 = inlined_call_operand.hbm [shape: f32[1,8,256], index: 3, kind: output, shape index: {1}]  }
   0x1   :  { %10 = vsyncpa [#allocation6], 0 }
   0x2   :  { %11 = vsyncpa [#allocation4], 0 }
   0x3   :  { %12 = vsyncpa [#allocation9], 0  ;;  %s225_s12 = smov [#allocation2]   ;;  %s226_s14 = smov [#allocation5]  }
   0x4   :  { %s25_s13 = sshll.u32 %s225_s12, 4  ;;  %s41_s15 = sshll.u32 %s226_s14, 4  ;;  %s26_s13 = int_to_ptr.vmem [resolvable:$true] %s25_s13  ;;  %s42_s15 = int_to_ptr.vmem [resolvable:$true] %s41_s15 }
   0x5   :  { %s145_s16 = scalar_lea.vmem %s26_s13, 256  ;;  %p150_p1 = scmp.lt.s32.totalorder %s26_s13, %s26_s13 }
   0x6   :  { %p146_p0 = scmp.ne.s32.totalorder %s26_s13, %s145_s16  ;;  %p151_p2 = scmp.lt.s32.totalorder %s145_s16, %s145_s16 }
   0x8   :  { %p152_p3 = por %p151_p2, %p150_p1 }
   0xa   :  { %p153_p4 = pnand %p152_p3, %p146_p0 }
   0xc   :  { %156 = shalt.err (!%p153_p4)
}
   0xd   :  { %28 = dma.hbm_to_vmem [thread:$0]  %s261_s0, 256, %s26_s13, [#allocation3]  }
   0xe   :  { %s165_s19 = scalar_lea.vmem %s42_s15, 256  ;;  %p170_p6 = scmp.lt.s32.totalorder %s42_s15, %s42_s15 }
   0xf   :  { %p166_p5 = scmp.ne.s32.totalorder %s42_s15, %s165_s19  ;;  %p171_p7 = scmp.lt.s32.totalorder %s165_s19, %s165_s19 }
  0x11   :  { %p172_p8 = por %p171_p7, %p170_p6 }
  0x13   :  { %p173_p9 = pnand %p172_p8, %p166_p5 }
  0x15   :  { %176 = shalt.err (!%p173_p9)
}
  0x16   :  { %44 = dma.hbm_to_vmem [thread:$0]  %s262_s1, 256, %s42_s15, [#allocation6]  }
  0x17   :  { %217 = dma.done.wait [#allocation3], 256  }
  0x18   :  { %218 = vsyncadd [#allocation3], 4294967040 }
  0x19   :  { %219 = dma.done.wait [#allocation6], 256  }
  0x1a   :  { %220 = vsyncadd [#allocation6], 4294967040  ;;  %s227_s22 = smov [#allocation7]   ;;  %v59_v0 = vld [vmem:[#allocation2] sm:$0xff]  ;;  %v61_v1 = vld [vmem:[#allocation5] sm:$0xff]  ;;  %s228_s0 = smov [#allocation8]  }
  0x1b   :  { %s105_s23 = sshll.u32 %s227_s22, 4  ;;  %v60_v2 = vld [vmem:[#allocation2 + $0x8] sm:$0xff]  ;;  %v63_v3 = vmul.f32 %v61_v1, %v59_v0  ;;  %v62_v4 = vld [vmem:[#allocation5 + $0x8] sm:$0xff]  ;;  %v65_v5 = vmul.f32 %v59_v0, %v59_v0  ;;  %v67_v6 = vmul.f32 %v61_v1, %v61_v1  ;;  %s115_s24 = sshll.u32 %s228_s0, 4  ;;  %s106_s23 = int_to_ptr.vmem [resolvable:$true] %s105_s23  ;;  %s116_s24 = int_to_ptr.vmem [resolvable:$true] %s115_s24 }
  0x1c   :  { %v66_v7 = vmul.f32 %v60_v2, %v60_v2  ;;  %v64_v8 = vmul.f32 %v62_v4, %v60_v2  ;;  %v68_v9 = vmul.f32 %v62_v4, %v62_v4  ;;  %s177_s1 = scalar_lea.vmem %s106_s23, 256  ;;  %p182_p11 = scmp.lt.s32.totalorder %s106_s23, %s106_s23 }
  0x1d   :  { %79 = vst [vmem:[#allocation7] sm:$0xff] %v63_v3  ;;  %v69_v10 = vadd.f32 %v67_v6, %v65_v5  ;;  %p178_p10 = scmp.ne.s32.totalorder %s106_s23, %s177_s1  ;;  %p183_p12 = scmp.lt.s32.totalorder %s177_s1, %s177_s1 }
  0x1e   :  { %80 = vst [vmem:[#allocation7 + $0x8] sm:$0xff] %v64_v8  ;;  %v70_v11 = vadd.f32 %v68_v9, %v66_v7 }
  0x1f   :  { %81 = vst [vmem:[#allocation8] sm:$0xff] %v69_v10  ;;  %p184_p13 = por %p183_p12, %p182_p11 }
  0x21   :  { %p185_p0 = pnand %p184_p13, %p178_p10 }
  0x23   :  { %188 = shalt.err (!%p185_p0)
}
  0x24   :  { %108 = dma.vmem_to_hbm [thread:$0]  %s106_s23, 256, %s263_s2, [#allocation4]   ;;  %82 = vst [vmem:[#allocation8 + $0x8] sm:$0xff] %v70_v11 }
  0x25   :  { %s197_s27 = scalar_lea.vmem %s116_s24, 256  ;;  %p202_p2 = scmp.lt.s32.totalorder %s116_s24, %s116_s24 }
  0x26   :  { %p198_p1 = scmp.ne.s32.totalorder %s116_s24, %s197_s27  ;;  %p203_p3 = scmp.lt.s32.totalorder %s197_s27, %s197_s27 }
  0x28   :  { %p204_p4 = por %p203_p3, %p202_p2 }
  0x2a   :  { %p205_p5 = pnand %p204_p4, %p198_p1 }
  0x2c   :  { %208 = shalt.err (!%p205_p5)
}
  0x2d   :  { %118 = dma.vmem_to_hbm [thread:$0]  %s116_s24, 256, %s264_s3, [#allocation9]  }
  0x2e   :  { %221 = dma.done.wait [#allocation4], 256  }
  0x2f   :  { %222 = vsyncadd [#allocation4], 4294967040 }
  0x30   :  { %223 = dma.done.wait [#allocation9], 256  }
  0x31   :  { %224 = vsyncadd [#allocation9], 4294967040 }
  0x32   :  { %125 = vsyncpa [#allocation3], 1 }
  0x33   :  { %126 = vsyncpa [#allocation6], 1 }
  0x34   :  { %127 = vsyncpa [#allocation4], 1 }
  0x35   :  { %128 = vsyncpa [#allocation9], 1 }

</bundles_post_ra>
